<compile_context>
chip_gen: v6e
topology: v6e:2x2x1
jax: 0.10.0
libtpu: 0.0.40
codegen_flags: <defaults>
</compile_context>

<pallas_src>
import functools

import jax
import jax.numpy as jnp
import numpy as np
from jax.experimental import pallas as pl
from jax.experimental.pallas import tpu as pltpu

HIDDEN = 128


def pgn_kernel(x_ref, w1_ref, b1_ref, w2_ref, b2_ref, o_ref):
    # Two MXU matmuls + VPU bias adds + ReLU, all inside one kernel body.
    x = x_ref[...]                                                    # (TB, D)
    h = jnp.dot(x, w1_ref[...], preferred_element_type=jnp.float32)  # (TB, H)
    h = jnp.maximum(h + b1_ref[...], 0.0)                             # bias + ReLU
    y = jnp.dot(h, w2_ref[...], preferred_element_type=jnp.float32)  # (TB, A)
    o_ref[...] = (y + b2_ref[...]).astype(o_ref.dtype)


def _pgn_forward_small(x, w1, b1, w2, b2):
    """Gridless path: single invocation, every operand one full VMEM block."""
    B, _ = x.shape
    A = w2.shape[1]
    vmem_spec = functools.partial(pl.BlockSpec, memory_space=pltpu.MemorySpace.VMEM)
    return pl.pallas_call(
        pgn_kernel,
        out_shape=jax.ShapeDtypeStruct((B, A), jnp.float32),
        in_specs=[vmem_spec() for _ in range(5)],
        out_specs=vmem_spec(),
    )(x, w1, b1, w2, b2)


def _pgn_forward_tiled(x, w1, b1, w2, b2, *, tb):
    """Batch-streaming path: x/out tiled over batch, weights VMEM-resident."""
    B, D = x.shape
    H = w1.shape[1]
    A = w2.shape[1]
    # Pad batch to a multiple of the tile so (tb, D)/(tb, A) blocks are legal
    # ((8,128) rule: tb is a multiple of 8, trailing dims equal full extents).
    Bp = pl.cdiv(B, tb) * tb
    if Bp != B:
        x = jnp.pad(x, ((0, Bp - B), (0, 0)))

    out = pl.pallas_call(
        pgn_kernel,
        out_shape=jax.ShapeDtypeStruct((Bp, A), jnp.float32),
        grid=(Bp // tb,),
        in_specs=[
            pl.BlockSpec((tb, D), lambda i: (i, 0)),   # stream activations
            pl.BlockSpec((D, H), lambda i: (0, 0)),    # weights pinned / resident
            pl.BlockSpec((1, H), lambda i: (0, 0)),
            pl.BlockSpec((H, A), lambda i: (0, 0)),
            pl.BlockSpec((1, A), lambda i: (0, 0)),
        ],
        out_specs=pl.BlockSpec((tb, A), lambda i: (i, 0)),
        compiler_params=pltpu.CompilerParams(
            dimension_semantics=("parallel",)),        # v7x: shard batch over 2 TCs
    )(x, w1, b1, w2, b2)
    return out[:B] if Bp != B else out


def pgn_forward(x, w1, b1, w2, b2, *, tile_b=1024):
    """PGN forward. Gridless path for small B, batch-tiled streaming for large B."""
    B = x.shape[0]
    if B <= tile_b:
        return _pgn_forward_small(x, w1, b1, w2, b2)
    return _pgn_forward_tiled(x, w1, b1, w2, b2, tb=tile_b)


def init_linear_params(key, in_features, out_features):
    # Deterministic init mimicking torch.nn.Linear defaults
    # (uniform weights/bias with bound 1/sqrt(fan_in)); stored transposed.
    kw, kb = jax.random.split(key)
    bound = 1.0 / np.sqrt(in_features)
    w = jax.random.uniform(kw, (in_features, out_features), jnp.float32,
                           minval=-bound, maxval=bound)
    b = jax.random.uniform(kb, (1, out_features), jnp.float32,
                           minval=-bound, maxval=bound)
    return w, b


def _reference(x, w1, b1, w2, b2):
    return jnp.maximum(x @ w1 + b1, 0.0) @ w2 + b2


if __name__ == "__main__":
    input_size = 4   # CartPole-v0 observation dim
    n_actions = 2    # CartPole-v0 action space

    key = jax.random.PRNGKey(0)
    k_x1, k_x2, k_l1, k_l2 = jax.random.split(key, 4)

    w1, b1 = init_linear_params(k_l1, input_size, HIDDEN)
    w2, b2 = init_linear_params(k_l2, HIDDEN, n_actions)

    # 1) Small batch -> gridless full-VMEM path (typical single-env policy step).
    x_small = jax.random.normal(k_x1, (8, input_size), jnp.float32)
    out_small = pgn_forward(x_small, w1, b1, w2, b2)
    jax.block_until_ready(out_small)
    np.testing.assert_allclose(np.asarray(out_small),
                               np.asarray(_reference(x_small, w1, b1, w2, b2)),
                               rtol=1e-5, atol=1e-5)

    # 2) Larger (rollout-buffer style) batch -> batch-tiled streaming path,
    #    with a non-multiple batch size to exercise the padding/slice logic.
    x_big = jax.random.normal(k_x2, (320, input_size), jnp.float32)
    out_big = pgn_forward(x_big, w1, b1, w2, b2, tile_b=128)
    jax.block_until_ready(out_big)
    np.testing.assert_allclose(np.asarray(out_big),
                               np.asarray(_reference(x_big, w1, b1, w2, b2)),
                               rtol=1e-5, atol=1e-5)

    print("KERNEL_OK")
</pallas_src>

<mosaic_0001>
module attributes {stable_mosaic.version = 11 : i64} {
  func.func @pgn_kernel(%arg0: memref<8x4xf32, #tpu.memory_space<vmem>>, %arg1: memref<4x128xf32, #tpu.memory_space<vmem>>, %arg2: memref<1x128xf32, #tpu.memory_space<vmem>>, %arg3: memref<128x2xf32, #tpu.memory_space<vmem>>, %arg4: memref<1x2xf32, #tpu.memory_space<vmem>>, %arg5: memref<8x2xf32, #tpu.memory_space<vmem>>) attributes {dimension_semantics = [], scalar_prefetch = 0 : i64, scratch_operands = 0 : i64, tpu.core_type = #tpu.core_type<tc>} {
    %c0 = arith.constant 0 : index
    %c0_0 = arith.constant 0 : index
    %0 = vector.load %arg0[%c0, %c0_0] : memref<8x4xf32, #tpu.memory_space<vmem>>, vector<8x4xf32>
    %c0_1 = arith.constant 0 : index
    %c0_2 = arith.constant 0 : index
    %1 = vector.load %arg1[%c0_1, %c0_2] : memref<4x128xf32, #tpu.memory_space<vmem>>, vector<4x128xf32>
    %cst = arith.constant dense<0.000000e+00> : vector<8x128xf32>
    %2 = tpu.matmul %0, %1, %cst {dimension_numbers = #tpu.dot_dimension_numbers<[1], [0], [0], [1], [0, 0, 1, 1], [], []>} : vector<8x4xf32>, vector<4x128xf32>, vector<8x128xf32> -> vector<8x128xf32>
    %c0_3 = arith.constant 0 : index
    %c0_4 = arith.constant 0 : index
    %3 = vector.load %arg2[%c0_3, %c0_4] : memref<1x128xf32, #tpu.memory_space<vmem>>, vector<1x128xf32>
    %4 = vector.broadcast %3 : vector<1x128xf32> to vector<8x128xf32>
    %5 = arith.addf %2, %4 : vector<8x128xf32>
    %cst_5 = arith.constant 0.000000e+00 : f32
    %6 = vector.broadcast %cst_5 : f32 to vector<8x128xf32>
    %7 = arith.maximumf %5, %6 : vector<8x128xf32>
    %c0_6 = arith.constant 0 : index
    %c0_7 = arith.constant 0 : index
    %8 = vector.load %arg3[%c0_6, %c0_7] : memref<128x2xf32, #tpu.memory_space<vmem>>, vector<128x2xf32>
    %cst_8 = arith.constant dense<0.000000e+00> : vector<8x2xf32>
    %9 = tpu.matmul %7, %8, %cst_8 {dimension_numbers = #tpu.dot_dimension_numbers<[1], [0], [0], [1], [0, 0, 1, 1], [], []>} : vector<8x128xf32>, vector<128x2xf32>, vector<8x2xf32> -> vector<8x2xf32>
    %c0_9 = arith.constant 0 : index
    %c0_10 = arith.constant 0 : index
    %10 = vector.load %arg4[%c0_9, %c0_10] : memref<1x2xf32, #tpu.memory_space<vmem>>, vector<1x2xf32>
    %11 = vector.broadcast %10 : vector<1x2xf32> to vector<8x2xf32>
    %12 = arith.addf %9, %11 : vector<8x2xf32>
    %c0_11 = arith.constant 0 : index
    %c0_12 = arith.constant 0 : index
    %13 = vector.load %arg5[%c0_11, %c0_12] : memref<8x2xf32, #tpu.memory_space<vmem>>, vector<8x2xf32>
    tpu.vector_store %arg5[%c0_11, %c0_12], %12 {strides = array<i32>} : memref<8x2xf32, #tpu.memory_space<vmem>>, vector<8x2xf32>,
    return
  }
}

</mosaic_0001>

<bundles_post_ra>
// kernel: tpu_custom_call.1
= control target key start
LH: loop header
LB: loop body
LE: loop exit
PB: predicated region body
PF: predicated region fallthrough
CT: control target
= control target key end

     0   :  { %vm33_vm0 = vcmask 1043456   ;;  %vm29_vm1 = vcmask 31744   ;;  %v272_v0 = vmov 0.0   ;;  %vm273_vm2 = vmmov 0   ;;  %s367_s1 = inlined_call_operand.vmem [shape: f32[4,128], index: 1, kind: input, shape index: {}]   ;;  %s368_s0 = inlined_call_operand.vmem [shape: f32[8,4], index: 0, kind: input, shape index: {}]   ;;  %s369_s3 = inlined_call_operand.vmem [shape: f32[128,2], index: 3, kind: input, shape index: {}]   ;;  %s370_s2 = inlined_call_operand.vmem [shape: f32[1,128], index: 2, kind: input, shape index: {}]   ;;  %s371_s4 = inlined_call_operand.vmem [shape: f32[1,2], index: 4, kind: input, shape index: {}]   ;;  %s372_s5 = inlined_call_operand.vmem [shape: f32[8,2], index: 5, kind: output, shape index: {}]  }
   0x1   :  { %230 = vmatprep.subr.mxu0 %v272_v0  ;;  %v21_v1 = vld [vmem:[%s367_s1] sm:$0xf]  ;;  %232 = vmatprep.mubr.msk.f32.mxu0 %vm273_vm2, %v272_v0  ;;  %v123_v3 = vld [vmem:[%s369_s3 + $0x78] sm:$0xff]  ;;  %v122_v4 = vld [vmem:[%s369_s3 + $0x70] sm:$0xff]  ;;  %vm201_vm3 = vcmask 15360  }
   0x2   :  { %v20_v2 = vld [vmem:[%s368_s0] sm:$0xff]  ;;  %231 = vmatpush3.msk.msra.mxu0 %vm33_vm0, %v21_v1  ;;  %235 = vmatprep.subr.mxu1 %v272_v0  ;;  %v121_v5 = vld [vmem:[%s369_s3 + $0x68] sm:$0xff]  ;;  %v119_v7 = vld [vmem:[%s369_s3 + $0x58] sm:$0xff] }
   0x3   :  { %233 = vmatmul.mubr.msk.f32.vlgmr.msra.gmra.mxu0 %vm29_vm1, %v20_v2  ;;  %236 = vmatpush3.msra.mxu1 %v123_v3  ;;  %v120_v6 = vld [vmem:[%s369_s3 + $0x60] sm:$0xff]  ;;  %v118_v8 = vld [vmem:[%s369_s3 + $0x50] sm:$0xff]  ;;  %v117_v9 = vld [vmem:[%s369_s3 + $0x48] sm:$0xff] }
   0x4   :  { %237 = vmatprep.subr.mxu1 %v272_v0  ;;  %267 = vmatprep.mubr.msk.f32.mxu1 %vm273_vm2, %v272_v0  ;;  %v116_v10 = vld [vmem:[%s369_s3 + $0x40] sm:$0xff]  ;;  %v115_v11 = vld [vmem:[%s369_s3 + $0x38] sm:$0xff]  ;;  %v114_v12 = vld [vmem:[%s369_s3 + $0x30] sm:$0xff] }
   0x5   :  { %238 = vmatpush3.msra.mxu1 %v122_v4  ;;  %v113_v13 = vld [vmem:[%s369_s3 + $0x28] sm:$0xff]  ;;  %v112_v14 = vld [vmem:[%s369_s3 + $0x20] sm:$0xff]  ;;  %v111_v15 = vld [vmem:[%s369_s3 + $0x18] sm:$0xff] }
   0x6   :  { %239 = vmatprep.subr.mxu1 %v272_v0  ;;  %v110_v16 = vld [vmem:[%s369_s3 + $0x10] sm:$0xff]  ;;  %v109_v17 = vld [vmem:[%s369_s3 + $0x8] sm:$0xff]  ;;  %v108_v18 = vld [vmem:[%s369_s3] sm:$0xff] }
   0x7   :  { %240 = vmatpush3.msra.mxu1 %v121_v5  ;;  %v207_v19 = vld [vmem:[%s370_s2] ss:$0 sm:$0xff] }
   0x8   :  { %241 = vmatprep.subr.mxu1 %v272_v0  ;;  %v210_v24 = vld [vmem:[%s371_s4] ss:$0 sm:$0xff] }
   0x9   :  { %242 = vmatpush3.msra.mxu1 %v120_v6 }
   0xa   :  { %243 = vmatprep.subr.mxu1 %v272_v0 }
   0xb   :  { %244 = vmatpush3.msra.mxu1 %v119_v7 }
   0xc   :  { %245 = vmatprep.subr.mxu1 %v272_v0 }
   0xd   :  { %246 = vmatpush3.msra.mxu1 %v118_v8 }
   0xe   :  { %247 = vmatprep.subr.mxu1 %v272_v0 }
   0xf   :  { %248 = vmatpush3.msra.mxu1 %v117_v9 }
  0x10   :  { %249 = vmatprep.subr.mxu1 %v272_v0 }
  0x11   :  { %250 = vmatpush3.msra.mxu1 %v116_v10 }
  0x12   :  { %251 = vmatprep.subr.mxu1 %v272_v0 }
  0x13   :  { %252 = vmatpush3.msra.mxu1 %v115_v11 }
  0x14   :  { %253 = vmatprep.subr.mxu1 %v272_v0 }
  0x15   :  { %254 = vmatpush3.msra.mxu1 %v114_v12 }
  0x16   :  { %255 = vmatprep.subr.mxu1 %v272_v0 }
  0x17   :  { %256 = vmatpush3.msra.mxu1 %v113_v13 }
  0x18   :  { %257 = vmatprep.subr.mxu1 %v272_v0 }
  0x19   :  { %258 = vmatpush3.msra.mxu1 %v112_v14 }
  0x1a   :  { %259 = vmatprep.subr.mxu1 %v272_v0 }
  0x1b   :  { %260 = vmatpush3.msra.mxu1 %v111_v15 }
  0x1c   :  { %261 = vmatprep.subr.mxu1 %v272_v0 }
  0x1d   :  { %262 = vmatpush3.msra.mxu1 %v110_v16 }
  0x1e   :  { %263 = vmatprep.subr.mxu1 %v272_v0 }
  0x1f   :  { %264 = vmatpush3.msra.mxu1 %v109_v17 }
  0x20   :  { %265 = vmatprep.subr.mxu1 %v272_v0 }
  0x21   :  { %266 = vmatpush3.msra.mxu1 %v108_v18 }
  0xc3   :  { %v103_v20 = vpop.f32.mrf.mxu0 }
  0xc4   :  { %v104_v21 = vadd.f32 %v207_v19, %v103_v20 }
  0xc5   :  { %v234_v22 = vpop.f32.mrf.mxu0 }
  0xc6   :  { %v107_v23 = vmax.f32 %v104_v21, 0.0 }
  0xc8   :  { %268 = vmatmul.mubr.f32.vlgmr.msra.gmra.mxu1 %v107_v23 }
 0x188   :  { %v197_v25 = vpop.f32.mrf.mxu1 }
 0x189   :  { %v198_v26 = vadd.f32 %v210_v24, %v197_v25 }
 0x18a   :  { %v269_v27 = vpop.f32.mrf.mxu1 }
 0x18b   :  { %202 = vst.msk [vmem:[%s372_s5] sm:$0xff] %vm201_vm3, %v198_v26 }

</bundles_post_ra>
